<compile_context>
chip_gen: v5e
topology: v5e:2x2
jax: 0.10.0
libtpu: 0.0.40
codegen_flags: <defaults>
</compile_context>

<pallas_src>
import jax
import jax.numpy as jnp
from jax import lax
from jax.experimental import pallas as pl
from jax.experimental.pallas import tpu as pltpu

_WORKSET_BUDGET = 24 * 1024 * 1024     # per-grid-step working-set target (bytes)
_VMEM_LIMIT = 48 * 1024 * 1024         # explicit scoped-VMEM limit (fits v7x 64 MiB/TC)
_MIN_BLOCKS = 8                        # keep the grid fed (megacore on v7x, pipelining)


def _cdiv(a, b):
    return -(-a // b)


def _occupancy_cap(total_units, batch, granule, min_blocks=_MIN_BLOCKS):
    """Largest tile size (in `granule` units) keeping batch * n_tiles >= min_blocks, if splittable."""
    want = _cdiv(min_blocks, batch)
    if want <= 1 or total_units < want * granule:
        return total_units
    return max(granule, (total_units // want) // granule * granule)


# ----------------------------------------------------------------------------------------------
# Small-C path: (N, C, S, 128) layout, VPU scalar-splat FMAs, weights in SMEM.
# ----------------------------------------------------------------------------------------------
def _make_vpu_kernel(C, Ch):
    def kernel(x_ref, w1a_ref, b1a_ref, w1b_ref, b1b_ref, w2_ref, b2_ref, out_ref):
        # x_ref / out_ref blocks: (1, C, St, 128). Each channel slab is a dense (St, 128) tile.
        xs = [x_ref[0, k].astype(jnp.float32) for k in range(C)]
        zs = []
        for c in range(Ch):                                   # pconv1 (both halves) + gating
            y1 = jnp.full_like(xs[0], b1a_ref[c])
            y2 = jnp.full_like(xs[0], b1b_ref[c])
            for k in range(C):
                y1 = y1 + w1a_ref[c * C + k] * xs[k]          # scalar splat from SMEM -> VPU FMA
                y2 = y2 + w1b_ref[c * C + k] * xs[k]
            zs.append(y1 * y2)
        for co in range(C):                                   # pconv2
            o = jnp.full_like(xs[0], b2_ref[co])
            for c in range(Ch):
                o = o + w2_ref[co * Ch + c] * zs[c]
            out_ref[0, co] = o.astype(out_ref.dtype)
    return kernel


def _sgu_small_c(x_nchw, w1, b1, w2, b2, N, C, Ch, H, W):
    HW = H * W
    ib = x_nchw.dtype.itemsize
    S_needed = _cdiv(HW, 128)
    # per 128-lane spatial row: double-buffered in + out blocks, plus live f32 slabs (xs, zs, temps)
    row_bytes = 128 * (4 * C * ib + (C + Ch + 3) * 4)
    St = max(1, _WORKSET_BUDGET // row_bytes)
    St = min(St, _occupancy_cap(S_needed, N, 8))
    if St >= S_needed:
        St = S_needed                    # block dim == full array dim (exempt from %8 rule)
    else:
        St = max(8, (St // 8) * 8)       # sublane-aligned tile
    n_tiles = _cdiv(S_needed, St)
    S_total = n_tiles * St
    HW_pad = S_total * 128

    x = x_nchw.reshape(N, C, HW)
    if HW_pad != HW:
        x = jnp.pad(x, ((0, 0), (0, 0), (0, HW_pad - HW)))
    x = x.reshape(N, C, S_total, 128)

    f32 = jnp.float32
    w1a = w1[:Ch].astype(f32).reshape(-1)
    w1b = w1[Ch:].astype(f32).reshape(-1)
    b1a = b1[:Ch].astype(f32)
    b1b = b1[Ch:].astype(f32)
    w2f = w2.astype(f32).reshape(-1)
    b2f = b2.astype(f32)

    smem = pl.BlockSpec(memory_space=pltpu.MemorySpace.SMEM)
    out = pl.pallas_call(
        _make_vpu_kernel(C, Ch),
        out_shape=jax.ShapeDtypeStruct((N, C, S_total, 128), x_nchw.dtype),
        grid=(N, n_tiles),
        in_specs=[
            pl.BlockSpec((1, C, St, 128), lambda n, t: (n, 0, t, 0)),   # activations (tiled)
            smem, smem, smem, smem, smem, smem,                         # weights / biases
        ],
        out_specs=pl.BlockSpec((1, C, St, 128), lambda n, t: (n, 0, t, 0)),
        compiler_params=pltpu.CompilerParams(
            dimension_semantics=("parallel", "parallel"),
            vmem_limit_bytes=_VMEM_LIMIT,
        ),
    )(x, w1a, b1a, w1b, b1b, w2f, b2f)

    out = out.reshape(N, C, HW_pad)[:, :, :HW]
    return out.reshape(N, C, H, W)


# ----------------------------------------------------------------------------------------------
# Large-C path: (N, C, HW) layout, MXU matmuls (bf16-native when the input is bf16).
# ----------------------------------------------------------------------------------------------
def _make_mxu_kernel(Ch, combined, high_precision):
    prec = lax.Precision.HIGHEST if high_precision else None

    if combined:
        def kernel(x_ref, w1_ref, b1_ref, w2_ref, b2_ref, out_ref):
            x = x_ref[0]                                              # (C, T), native dtype
            h = jnp.dot(w1_ref[...], x, preferred_element_type=jnp.float32,
                        precision=prec) + b1_ref[...]                 # (2Ch, T) f32
            z = (h[:Ch] * h[Ch:]).astype(x.dtype)                     # tile-aligned sublane split
            o = jnp.dot(w2_ref[...], z, preferred_element_type=jnp.float32,
                        precision=prec) + b2_ref[...]
            out_ref[0] = o.astype(out_ref.dtype)
    else:
        def kernel(x_ref, w1a_ref, b1a_ref, w1b_ref, b1b_ref, w2_ref, b2_ref, out_ref):
            x = x_ref[0]
            y1 = jnp.dot(w1a_ref[...], x, preferred_element_type=jnp.float32,
                         precision=prec) + b1a_ref[...]
            y2 = jnp.dot(w1b_ref[...], x, preferred_element_type=jnp.float32,
                         precision=prec) + b1b_ref[...]
            z = (y1 * y2).astype(x.dtype)
            o = jnp.dot(w2_ref[...], z, preferred_element_type=jnp.float32,
                        precision=prec) + b2_ref[...]
            out_ref[0] = o.astype(out_ref.dtype)
    return kernel


def _sgu_mxu(x_nchw, w1, b1, w2, b2, N, C, Ch, H, W):
    HW = H * W
    ib = x_nchw.dtype.itemsize
    G = 512                                                   # lane granule (MXU-friendly N dim)
    # per spatial pixel: double-buffered in+out blocks + live f32 slabs (h / y1,y2, z, o)
    px_bytes = 4 * C * ib + (3 * Ch + C + 2) * 4
    T = max(G, (_WORKSET_BUDGET // px_bytes) // G * G)
    cap_g = _occupancy_cap(_cdiv(HW, G), N, 1)
    T = min(T, max(G, cap_g * G))
    n_tiles = _cdiv(HW, T)
    HW_pad = n_tiles * T

    x = x_nchw.reshape(N, C, HW)
    if HW_pad != HW:
        x = jnp.pad(x, ((0, 0), (0, 0), (0, HW_pad - HW)))

    cdt = x_nchw.dtype                                        # MXU operand dtype (bf16 stays bf16)
    f32 = jnp.float32
    high_precision = (cdt == jnp.float32)
    combined = (Ch % 8 == 0)

    if combined:
        weights = (w1.astype(cdt), b1.astype(f32).reshape(2 * Ch, 1),
                   w2.astype(cdt), b2.astype(f32).reshape(C, 1))
        w_specs = [pl.BlockSpec((2 * Ch, C), lambda n, t: (0, 0)),
                   pl.BlockSpec((2 * Ch, 1), lambda n, t: (0, 0)),
                   pl.BlockSpec((C, Ch), lambda n, t: (0, 0)),
                   pl.BlockSpec((C, 1), lambda n, t: (0, 0))]
    else:
        weights = (w1[:Ch].astype(cdt), b1[:Ch].astype(f32).reshape(Ch, 1),
                   w1[Ch:].astype(cdt), b1[Ch:].astype(f32).reshape(Ch, 1),
                   w2.astype(cdt), b2.astype(f32).reshape(C, 1))
        w_specs = [pl.BlockSpec((Ch, C), lambda n, t: (0, 0)),
                   pl.BlockSpec((Ch, 1), lambda n, t: (0, 0)),
                   pl.BlockSpec((Ch, C), lambda n, t: (0, 0)),
                   pl.BlockSpec((Ch, 1), lambda n, t: (0, 0)),
                   pl.BlockSpec((C, Ch), lambda n, t: (0, 0)),
                   pl.BlockSpec((C, 1), lambda n, t: (0, 0))]

    out = pl.pallas_call(
        _make_mxu_kernel(Ch, combined, high_precision),
        out_shape=jax.ShapeDtypeStruct((N, C, HW_pad), x_nchw.dtype),
        grid=(N, n_tiles),
        in_specs=[pl.BlockSpec((1, C, T), lambda n, t: (n, 0, t))] + w_specs,
        out_specs=pl.BlockSpec((1, C, T), lambda n, t: (n, 0, t)),
        compiler_params=pltpu.CompilerParams(
            dimension_semantics=("parallel", "parallel"),
            vmem_limit_bytes=_VMEM_LIMIT,
        ),
    )(x, *weights)

    return out[:, :, :HW].reshape(N, C, H, W)


# ----------------------------------------------------------------------------------------------
# Public entry point
# ----------------------------------------------------------------------------------------------
def spatial_gating_unit(x_nchw, params):
    """SpatialGatingUnit forward. x_nchw: (N, C, H, W) -> (N, C, H, W).

    params = (w1, b1, w2, b2) with PyTorch conv layouts squeezed:
      pconv1.weight (2C, C, 1, 1) -> w1 (2C, C),  pconv1.bias -> b1 (2C,)
      pconv2.weight (C, Ch, 1, 1) -> w2 (C, Ch),  pconv2.bias -> b2 (C,)
    """
    w1, b1, w2, b2 = params
    N, C, H, W = x_nchw.shape
    Ch = w1.shape[0] // 2
    if C <= 8:
        return _sgu_small_c(x_nchw, w1, b1, w2, b2, N, C, Ch, H, W)
    return _sgu_mxu(x_nchw, w1, b1, w2, b2, N, C, Ch, H, W)


def make_params(key, f_number, excitation_factor=2):
    C = f_number
    C2 = int(excitation_factor * f_number)
    ks = jax.random.split(key, 4)
    w1 = jax.random.normal(ks[0], (C2, C), jnp.float32) * 0.2
    b1 = jax.random.normal(ks[1], (C2,), jnp.float32) * 0.05
    w2 = jax.random.normal(ks[2], (C, C2 // 2), jnp.float32) * 0.2
    b2 = jax.random.normal(ks[3], (C,), jnp.float32) * 0.05
    return (w1, b1, w2, b2)


def _reference(x_nchw, params):
    """Pure-JAX reference of the PyTorch SpatialGatingUnit forward (NCHW)."""
    w1, b1, w2, b2 = params
    Ch = w1.shape[0] // 2
    h = jnp.einsum('oc,nchw->nohw', w1, x_nchw) + b1[None, :, None, None]
    z = h[:, :Ch] * h[:, Ch:]
    return jnp.einsum('oc,nchw->nohw', w2, z) + b2[None, :, None, None]


if __name__ == "__main__":
    key = jax.random.PRNGKey(0)
    k_x, k_p, k_x2, k_p2 = jax.random.split(key, 4)

    # Test 1: tiny-C configuration (VPU scalar-splat path), matches the module's small test shape.
    N, C, H, W = 2, 4, 16, 16
    x = jax.random.normal(k_x, (N, C, H, W), jnp.float32)
    params = make_params(k_p, C)
    out = jax.block_until_ready(spatial_gating_unit(x, params))
    ref = _reference(x, params)
    assert out.shape == (N, C, H, W)
    assert jnp.allclose(out, ref, atol=1e-4, rtol=1e-4), "small-C path mismatch vs reference"

    # Test 2: larger-C configuration (MXU path, combined pconv1 matmul + sublane split).
    N2, C2, H2, W2 = 2, 32, 8, 8
    x2 = jax.random.normal(k_x2, (N2, C2, H2, W2), jnp.float32)
    params2 = make_params(k_p2, C2)
    out2 = jax.block_until_ready(spatial_gating_unit(x2, params2))
    ref2 = _reference(x2, params2)
    assert out2.shape == (N2, C2, H2, W2)
    assert jnp.allclose(out2, ref2, atol=1e-2, rtol=1e-2), "MXU path mismatch vs reference"

    print("KERNEL_OK")
</pallas_src>

<mosaic_0001>
module attributes {stable_mosaic.version = 11 : i64} {
  func.func @kernel(%arg0: i32, %arg1: i32, %arg2: memref<1x4x2x128xf32, #tpu.memory_space<vmem>>, %arg3: memref<16xf32, #tpu.memory_space<smem>>, %arg4: memref<4xf32, #tpu.memory_space<smem>>, %arg5: memref<16xf32, #tpu.memory_space<smem>>, %arg6: memref<4xf32, #tpu.memory_space<smem>>, %arg7: memref<16xf32, #tpu.memory_space<smem>>, %arg8: memref<4xf32, #tpu.memory_space<smem>>, %arg9: memref<1x4x2x128xf32, #tpu.memory_space<vmem>>) attributes {dimension_semantics = [#tpu.dimension_semantics<parallel>, #tpu.dimension_semantics<parallel>], iteration_bounds = array<i64: 2, 1>, scalar_prefetch = 0 : i64, scratch_operands = 0 : i64, tpu.core_type = #tpu.core_type<tc>, window_params = [{transform_indices = @transform_0, window_bounds = array<i64: 1, 4, 2, 128>}, {transform_indices = @transform_1, window_bounds = array<i64: 16>}, {transform_indices = @transform_2, window_bounds = array<i64: 4>}, {transform_indices = @transform_3, window_bounds = array<i64: 16>}, {transform_indices = @transform_4, window_bounds = array<i64: 4>}, {transform_indices = @transform_5, window_bounds = array<i64: 16>}, {transform_indices = @transform_6, window_bounds = array<i64: 4>}, {transform_indices = @transform_7, window_bounds = array<i64: 1, 4, 2, 128>}]} {
    %c0 = arith.constant 0 : index
    %c0_0 = arith.constant 0 : index
    %c0_1 = arith.constant 0 : index
    %c0_2 = arith.constant 0 : index
    %0 = vector.load %arg2[%c0, %c0_0, %c0_1, %c0_2] : memref<1x4x2x128xf32, #tpu.memory_space<vmem>>, vector<1x1x2x128xf32>
    %1 = vector.shape_cast %0 : vector<1x1x2x128xf32> to vector<2x128xf32>
    %c0_3 = arith.constant 0 : index
    %c1 = arith.constant 1 : index
    %c0_4 = arith.constant 0 : index
    %c0_5 = arith.constant 0 : index
    %2 = vector.load %arg2[%c0_3, %c1, %c0_4, %c0_5] : memref<1x4x2x128xf32, #tpu.memory_space<vmem>>, vector<1x1x2x128xf32>
    %3 = vector.shape_cast %2 : vector<1x1x2x128xf32> to vector<2x128xf32>
    %c0_6 = arith.constant 0 : index
    %c2 = arith.constant 2 : index
    %c0_7 = arith.constant 0 : index
    %c0_8 = arith.constant 0 : index
    %4 = vector.load %arg2[%c0_6, %c2, %c0_7, %c0_8] : memref<1x4x2x128xf32, #tpu.memory_space<vmem>>, vector<1x1x2x128xf32>
    %5 = vector.shape_cast %4 : vector<1x1x2x128xf32> to vector<2x128xf32>
    %c0_9 = arith.constant 0 : index
    %c3 = arith.constant 3 : index
    %c0_10 = arith.constant 0 : index
    %c0_11 = arith.constant 0 : index
    %6 = vector.load %arg2[%c0_9, %c3, %c0_10, %c0_11] : memref<1x4x2x128xf32, #tpu.memory_space<vmem>>, vector<1x1x2x128xf32>
    %7 = vector.shape_cast %6 : vector<1x1x2x128xf32> to vector<2x128xf32>
    %c0_12 = arith.constant 0 : index
    %8 = memref.load %arg4[%c0_12] : memref<4xf32, #tpu.memory_space<smem>>
    %9 = vector.broadcast %8 : f32 to vector<2x128xf32>
    %c0_13 = arith.constant 0 : index
    %10 = memref.load %arg6[%c0_13] : memref<4xf32, #tpu.memory_space<smem>>
    %11 = vector.broadcast %10 : f32 to vector<2x128xf32>
    %c0_14 = arith.constant 0 : index
    %12 = memref.load %arg3[%c0_14] : memref<16xf32, #tpu.memory_space<smem>>
    %13 = vector.broadcast %12 : f32 to vector<2x128xf32>
    %14 = arith.mulf %13, %1 : vector<2x128xf32>
    %15 = arith.addf %9, %14 : vector<2x128xf32>
    %c0_15 = arith.constant 0 : index
    %16 = memref.load %arg5[%c0_15] : memref<16xf32, #tpu.memory_space<smem>>
    %17 = vector.broadcast %16 : f32 to vector<2x128xf32>
    %18 = arith.mulf %17, %1 : vector<2x128xf32>
    %19 = arith.addf %11, %18 : vector<2x128xf32>
    %c1_16 = arith.constant 1 : index
    %20 = memref.load %arg3[%c1_16] : memref<16xf32, #tpu.memory_space<smem>>
    %21 = vector.broadcast %20 : f32 to vector<2x128xf32>
    %22 = arith.mulf %21, %3 : vector<2x128xf32>
    %23 = arith.addf %15, %22 : vector<2x128xf32>
    %c1_17 = arith.constant 1 : index
    %24 = memref.load %arg5[%c1_17] : memref<16xf32, #tpu.memory_space<smem>>
    %25 = vector.broadcast %24 : f32 to vector<2x128xf32>
    %26 = arith.mulf %25, %3 : vector<2x128xf32>
    %27 = arith.addf %19, %26 : vector<2x128xf32>
    %c2_18 = arith.constant 2 : index
    %28 = memref.load %arg3[%c2_18] : memref<16xf32, #tpu.memory_space<smem>>
    %29 = vector.broadcast %28 : f32 to vector<2x128xf32>
    %30 = arith.mulf %29, %5 : vector<2x128xf32>
    %31 = arith.addf %23, %30 : vector<2x128xf32>
    %c2_19 = arith.constant 2 : index
    %32 = memref.load %arg5[%c2_19] : memref<16xf32, #tpu.memory_space<smem>>
    %33 = vector.broadcast %32 : f32 to vector<2x128xf32>
    %34 = arith.mulf %33, %5 : vector<2x128xf32>
    %35 = arith.addf %27, %34 : vector<2x128xf32>
    %c3_20 = arith.constant 3 : index
    %36 = memref.load %arg3[%c3_20] : memref<16xf32, #tpu.memory_space<smem>>
    %37 = vector.broadcast %36 : f32 to vector<2x128xf32>
    %38 = arith.mulf %37, %7 : vector<2x128xf32>
    %39 = arith.addf %31, %38 : vector<2x128xf32>
    %c3_21 = arith.constant 3 : index
    %40 = memref.load %arg5[%c3_21] : memref<16xf32, #tpu.memory_space<smem>>
    %41 = vector.broadcast %40 : f32 to vector<2x128xf32>
    %42 = arith.mulf %41, %7 : vector<2x128xf32>
    %43 = arith.addf %35, %42 : vector<2x128xf32>
    %44 = arith.mulf %39, %43 : vector<2x128xf32>
    %c1_22 = arith.constant 1 : index
    %45 = memref.load %arg4[%c1_22] : memref<4xf32, #tpu.memory_space<smem>>
    %46 = vector.broadcast %45 : f32 to vector<2x128xf32>
    %c1_23 = arith.constant 1 : index
    %47 = memref.load %arg6[%c1_23] : memref<4xf32, #tpu.memory_space<smem>>
    %48 = vector.broadcast %47 : f32 to vector<2x128xf32>
    %c4 = arith.constant 4 : index
    %49 = memref.load %arg3[%c4] : memref<16xf32, #tpu.memory_space<smem>>
    %50 = vector.broadcast %49 : f32 to vector<2x128xf32>
    %51 = arith.mulf %50, %1 : vector<2x128xf32>
    %52 = arith.addf %46, %51 : vector<2x128xf32>
    %c4_24 = arith.constant 4 : index
    %53 = memref.load %arg5[%c4_24] : memref<16xf32, #tpu.memory_space<smem>>
    %54 = vector.broadcast %53 : f32 to vector<2x128xf32>
    %55 = arith.mulf %54, %1 : vector<2x128xf32>
    %56 = arith.addf %48, %55 : vector<2x128xf32>
    %c5 = arith.constant 5 : index
    %57 = memref.load %arg3[%c5] : memref<16xf32, #tpu.memory_space<smem>>
    %58 = vector.broadcast %57 : f32 to vector<2x128xf32>
    %59 = arith.mulf %58, %3 : vector<2x128xf32>
    %60 = arith.addf %52, %59 : vector<2x128xf32>
    %c5_25 = arith.constant 5 : index
    %61 = memref.load %arg5[%c5_25] : memref<16xf32, #tpu.memory_space<smem>>
    %62 = vector.broadcast %61 : f32 to vector<2x128xf32>
    %63 = arith.mulf %62, %3 : vector<2x128xf32>
    %64 = arith.addf %56, %63 : vector<2x128xf32>
    %c6 = arith.constant 6 : index
    %65 = memref.load %arg3[%c6] : memref<16xf32, #tpu.memory_space<smem>>
    %66 = vector.broadcast %65 : f32 to vector<2x128xf32>
    %67 = arith.mulf %66, %5 : vector<2x128xf32>
    %68 = arith.addf %60, %67 : vector<2x128xf32>
    %c6_26 = arith.constant 6 : index
    %69 = memref.load %arg5[%c6_26] : memref<16xf32, #tpu.memory_space<smem>>
    %70 = vector.broadcast %69 : f32 to vector<2x128xf32>
    %71 = arith.mulf %70, %5 : vector<2x128xf32>
    %72 = arith.addf %64, %71 : vector<2x128xf32>
    %c7 = arith.constant 7 : index
    %73 = memref.load %arg3[%c7] : memref<16xf32, #tpu.memory_space<smem>>
    %74 = vector.broadcast %73 : f32 to vector<2x128xf32>
    %75 = arith.mulf %74, %7 : vector<2x128xf32>
    %76 = arith.addf %68, %75 : vector<2x128xf32>
    %c7_27 = arith.constant 7 : index
    %77 = memref.load %arg5[%c7_27] : memref<16xf32, #tpu.memory_space<smem>>
    %78 = vector.broadcast %77 : f32 to vector<2x128xf32>
    %79 = arith.mulf %78, %7 : vector<2x128xf32>
    %80 = arith.addf %72, %79 : vector<2x128xf32>
    %81 = arith.mulf %76, %80 : vector<2x128xf32>
    %c2_28 = arith.constant 2 : index
    %82 = memref.load %arg4[%c2_28] : memref<4xf32, #tpu.memory_space<smem>>
    %83 = vector.broadcast %82 : f32 to vector<2x128xf32>
    %c2_29 = arith.constant 2 : index
    %84 = memref.load %arg6[%c2_29] : memref<4xf32, #tpu.memory_space<smem>>
    %85 = vector.broadcast %84 : f32 to vector<2x128xf32>
    %c8 = arith.constant 8 : index
    %86 = memref.load %arg3[%c8] : memref<16xf32, #tpu.memory_space<smem>>
    %87 = vector.broadcast %86 : f32 to vector<2x128xf32>
    %88 = arith.mulf %87, %1 : vector<2x128xf32>
    %89 = arith.addf %83, %88 : vector<2x128xf32>
    %c8_30 = arith.constant 8 : index
    %90 = memref.load %arg5[%c8_30] : memref<16xf32, #tpu.memory_space<smem>>
    %91 = vector.broadcast %90 : f32 to vector<2x128xf32>
    %92 = arith.mulf %91, %1 : vector<2x128xf32>
    %93 = arith.addf %85, %92 : vector<2x128xf32>
    %c9 = arith.constant 9 : index
    %94 = memref.load %arg3[%c9] : memref<16xf32, #tpu.memory_space<smem>>
    %95 = vector.broadcast %94 : f32 to vector<2x128xf32>
    %96 = arith.mulf %95, %3 : vector<2x128xf32>
    %97 = arith.addf %89, %96 : vector<2x128xf32>
    %c9_31 = arith.constant 9 : index
    %98 = memref.load %arg5[%c9_31] : memref<16xf32, #tpu.memory_space<smem>>
    %99 = vector.broadcast %98 : f32 to vector<2x128xf32>
    %100 = arith.mulf %99, %3 : vector<2x128xf32>
    %101 = arith.addf %93, %100 : vector<2x128xf32>
    %c10 = arith.constant 10 : index
    %102 = memref.load %arg3[%c10] : memref<16xf32, #tpu.memory_space<smem>>
    %103 = vector.broadcast %102 : f32 to vector<2x128xf32>
    %104 = arith.mulf %103, %5 : vector<2x128xf32>
    %105 = arith.addf %97, %104 : vector<2x128xf32>
    %c10_32 = arith.constant 10 : index
    %106 = memref.load %arg5[%c10_32] : memref<16xf32, #tpu.memory_space<smem>>
    %107 = vector.broadcast %106 : f32 to vector<2x128xf32>
    %108 = arith.mulf %107, %5 : vector<2x128xf32>
    %109 = arith.addf %101, %108 : vector<2x128xf32>
    %c11 = arith.constant 11 : index
    %110 = memref.load %arg3[%c11] : memref<16xf32, #tpu.memory_space<smem>>
    %111 = vector.broadcast %110 : f32 to vector<2x128xf32>
    %112 = arith.mulf %111, %7 : vector<2x128xf32>
    %113 = arith.addf %105, %112 : vector<2x128xf32>
    %c11_33 = arith.constant 11 : index
    %114 = memref.load %arg5[%c11_33] : memref<16xf32, #tpu.memory_space<smem>>
    %115 = vector.broadcast %114 : f32 to vector<2x128xf32>
    %116 = arith.mulf %115, %7 : vector<2x128xf32>
    %117 = arith.addf %109, %116 : vector<2x128xf32>
    %118 = arith.mulf %113, %117 : vector<2x128xf32>
    %c3_34 = arith.constant 3 : index
    %119 = memref.load %arg4[%c3_34] : memref<4xf32, #tpu.memory_space<smem>>
    %120 = vector.broadcast %119 : f32 to vector<2x128xf32>
    %c3_35 = arith.constant 3 : index
    %121 = memref.load %arg6[%c3_35] : memref<4xf32, #tpu.memory_space<smem>>
    %122 = vector.broadcast %121 : f32 to vector<2x128xf32>
    %c12 = arith.constant 12 : index
    %123 = memref.load %arg3[%c12] : memref<16xf32, #tpu.memory_space<smem>>
    %124 = vector.broadcast %123 : f32 to vector<2x128xf32>
    %125 = arith.mulf %124, %1 : vector<2x128xf32>
    %126 = arith.addf %120, %125 : vector<2x128xf32>
    %c12_36 = arith.constant 12 : index
    %127 = memref.load %arg5[%c12_36] : memref<16xf32, #tpu.memory_space<smem>>
    %128 = vector.broadcast %127 : f32 to vector<2x128xf32>
    %129 = arith.mulf %128, %1 : vector<2x128xf32>
    %130 = arith.addf %122, %129 : vector<2x128xf32>
    %c13 = arith.constant 13 : index
    %131 = memref.load %arg3[%c13] : memref<16xf32, #tpu.memory_space<smem>>
    %132 = vector.broadcast %131 : f32 to vector<2x128xf32>
    %133 = arith.mulf %132, %3 : vector<2x128xf32>
    %134 = arith.addf %126, %133 : vector<2x128xf32>
    %c13_37 = arith.constant 13 : index
    %135 = memref.load %arg5[%c13_37] : memref<16xf32, #tpu.memory_space<smem>>
    %136 = vector.broadcast %135 : f32 to vector<2x128xf32>
    %137 = arith.mulf %136, %3 : vector<2x128xf32>
    %138 = arith.addf %130, %137 : vector<2x128xf32>
    %c14 = arith.constant 14 : index
    %139 = memref.load %arg3[%c14] : memref<16xf32, #tpu.memory_space<smem>>
    %140 = vector.broadcast %139 : f32 to vector<2x128xf32>
    %141 = arith.mulf %140, %5 : vector<2x128xf32>
    %142 = arith.addf %134, %141 : vector<2x128xf32>
    %c14_38 = arith.constant 14 : index
    %143 = memref.load %arg5[%c14_38] : memref<16xf32, #tpu.memory_space<smem>>
    %144 = vector.broadcast %143 : f32 to vector<2x128xf32>
    %145 = arith.mulf %144, %5 : vector<2x128xf32>
    %146 = arith.addf %138, %145 : vector<2x128xf32>
    %c15 = arith.constant 15 : index
    %147 = memref.load %arg3[%c15] : memref<16xf32, #tpu.memory_space<smem>>
    %148 = vector.broadcast %147 : f32 to vector<2x128xf32>
    %149 = arith.mulf %148, %7 : vector<2x128xf32>
    %150 = arith.addf %142, %149 : vector<2x128xf32>
    %c15_39 = arith.constant 15 : index
    %151 = memref.load %arg5[%c15_39] : memref<16xf32, #tpu.memory_space<smem>>
    %152 = vector.broadcast %151 : f32 to vector<2x128xf32>
    %153 = arith.mulf %152, %7 : vector<2x128xf32>
    %154 = arith.addf %146, %153 : vector<2x128xf32>
    %155 = arith.mulf %150, %154 : vector<2x128xf32>
    %c0_40 = arith.constant 0 : index
    %156 = memref.load %arg8[%c0_40] : memref<4xf32, #tpu.memory_space<smem>>
    %157 = vector.broadcast %156 : f32 to vector<2x128xf32>
    %c0_41 = arith.constant 0 : index
    %158 = memref.load %arg7[%c0_41] : memref<16xf32, #tpu.memory_space<smem>>
    %159 = vector.broadcast %158 : f32 to vector<2x128xf32>
    %160 = arith.mulf %159, %44 : vector<2x128xf32>
    %161 = arith.addf %157, %160 : vector<2x128xf32>
    %c1_42 = arith.constant 1 : index
    %162 = memref.load %arg7[%c1_42] : memref<16xf32, #tpu.memory_space<smem>>
    %163 = vector.broadcast %162 : f32 to vector<2x128xf32>
    %164 = arith.mulf %163, %81 : vector<2x128xf32>
    %165 = arith.addf %161, %164 : vector<2x128xf32>
    %c2_43 = arith.constant 2 : index
    %166 = memref.load %arg7[%c2_43] : memref<16xf32, #tpu.memory_space<smem>>
    %167 = vector.broadcast %166 : f32 to vector<2x128xf32>
    %168 = arith.mulf %167, %118 : vector<2x128xf32>
    %169 = arith.addf %165, %168 : vector<2x128xf32>
    %c3_44 = arith.constant 3 : index
    %170 = memref.load %arg7[%c3_44] : memref<16xf32, #tpu.memory_space<smem>>
    %171 = vector.broadcast %170 : f32 to vector<2x128xf32>
    %172 = arith.mulf %171, %155 : vector<2x128xf32>
    %173 = arith.addf %169, %172 : vector<2x128xf32>
    %c0_45 = arith.constant 0 : index
    %c0_46 = arith.constant 0 : index
    %c0_47 = arith.constant 0 : index
    %c0_48 = arith.constant 0 : index
    %174 = vector.load %arg9[%c0_45, %c0_46, %c0_47, %c0_48] : memref<1x4x2x128xf32, #tpu.memory_space<vmem>>, vector<1x1x2x128xf32>
    %175 = vector.shape_cast %174 : vector<1x1x2x128xf32> to vector<2x128xf32>
    %176 = vector.shape_cast %173 : vector<2x128xf32> to vector<1x1x2x128xf32>
    tpu.vector_store %arg9[%c0_45, %c0_46, %c0_47, %c0_48], %176 {strides = array<i32>} : memref<1x4x2x128xf32, #tpu.memory_space<vmem>>, vector<1x1x2x128xf32>,
    %c1_49 = arith.constant 1 : index
    %177 = memref.load %arg8[%c1_49] : memref<4xf32, #tpu.memory_space<smem>>
    %178 = vector.broadcast %177 : f32 to vector<2x128xf32>
    %c4_50 = arith.constant 4 : index
    %179 = memref.load %arg7[%c4_50] : memref<16xf32, #tpu.memory_space<smem>>
    %180 = vector.broadcast %179 : f32 to vector<2x128xf32>
    %181 = arith.mulf %180, %44 : vector<2x128xf32>
    %182 = arith.addf %178, %181 : vector<2x128xf32>
    %c5_51 = arith.constant 5 : index
    %183 = memref.load %arg7[%c5_51] : memref<16xf32, #tpu.memory_space<smem>>
    %184 = vector.broadcast %183 : f32 to vector<2x128xf32>
    %185 = arith.mulf %184, %81 : vector<2x128xf32>
    %186 = arith.addf %182, %185 : vector<2x128xf32>
    %c6_52 = arith.constant 6 : index
    %187 = memref.load %arg7[%c6_52] : memref<16xf32, #tpu.memory_space<smem>>
    %188 = vector.broadcast %187 : f32 to vector<2x128xf32>
    %189 = arith.mulf %188, %118 : vector<2x128xf32>
    %190 = arith.addf %186, %189 : vector<2x128xf32>
    %c7_53 = arith.constant 7 : index
    %191 = memref.load %arg7[%c7_53] : memref<16xf32, #tpu.memory_space<smem>>
    %192 = vector.broadcast %191 : f32 to vector<2x128xf32>
    %193 = arith.mulf %192, %155 : vector<2x128xf32>
    %194 = arith.addf %190, %193 : vector<2x128xf32>
    %c0_54 = arith.constant 0 : index
    %c1_55 = arith.constant 1 : index
    %c0_56 = arith.constant 0 : index
    %c0_57 = arith.constant 0 : index
    %195 = vector.load %arg9[%c0_54, %c1_55, %c0_56, %c0_57] : memref<1x4x2x128xf32, #tpu.memory_space<vmem>>, vector<1x1x2x128xf32>
    %196 = vector.shape_cast %195 : vector<1x1x2x128xf32> to vector<2x128xf32>
    %197 = vector.shape_cast %194 : vector<2x128xf32> to vector<1x1x2x128xf32>
    tpu.vector_store %arg9[%c0_54, %c1_55, %c0_56, %c0_57], %197 {strides = array<i32>} : memref<1x4x2x128xf32, #tpu.memory_space<vmem>>, vector<1x1x2x128xf32>,
    %c2_58 = arith.constant 2 : index
    %198 = memref.load %arg8[%c2_58] : memref<4xf32, #tpu.memory_space<smem>>
    %199 = vector.broadcast %198 : f32 to vector<2x128xf32>
    %c8_59 = arith.constant 8 : index
    %200 = memref.load %arg7[%c8_59] : memref<16xf32, #tpu.memory_space<smem>>
    %201 = vector.broadcast %200 : f32 to vector<2x128xf32>
    %202 = arith.mulf %201, %44 : vector<2x128xf32>
    %203 = arith.addf %199, %202 : vector<2x128xf32>
    %c9_60 = arith.constant 9 : index
    %204 = memref.load %arg7[%c9_60] : memref<16xf32, #tpu.memory_space<smem>>
    %205 = vector.broadcast %204 : f32 to vector<2x128xf32>
    %206 = arith.mulf %205, %81 : vector<2x128xf32>
    %207 = arith.addf %203, %206 : vector<2x128xf32>
    %c10_61 = arith.constant 10 : index
    %208 = memref.load %arg7[%c10_61] : memref<16xf32, #tpu.memory_space<smem>>
    %209 = vector.broadcast %208 : f32 to vector<2x128xf32>
    %210 = arith.mulf %209, %118 : vector<2x128xf32>
    %211 = arith.addf %207, %210 : vector<2x128xf32>
    %c11_62 = arith.constant 11 : index
    %212 = memref.load %arg7[%c11_62] : memref<16xf32, #tpu.memory_space<smem>>
    %213 = vector.broadcast %212 : f32 to vector<2x128xf32>
    %214 = arith.mulf %213, %155 : vector<2x128xf32>
    %215 = arith.addf %211, %214 : vector<2x128xf32>
    %c0_63 = arith.constant 0 : index
    %c2_64 = arith.constant 2 : index
    %c0_65 = arith.constant 0 : index
    %c0_66 = arith.constant 0 : index
    %216 = vector.load %arg9[%c0_63, %c2_64, %c0_65, %c0_66] : memref<1x4x2x128xf32, #tpu.memory_space<vmem>>, vector<1x1x2x128xf32>
    %217 = vector.shape_cast %216 : vector<1x1x2x128xf32> to vector<2x128xf32>
    %218 = vector.shape_cast %215 : vector<2x128xf32> to vector<1x1x2x128xf32>
    tpu.vector_store %arg9[%c0_63, %c2_64, %c0_65, %c0_66], %218 {strides = array<i32>} : memref<1x4x2x128xf32, #tpu.memory_space<vmem>>, vector<1x1x2x128xf32>,
    %c3_67 = arith.constant 3 : index
    %219 = memref.load %arg8[%c3_67] : memref<4xf32, #tpu.memory_space<smem>>
    %220 = vector.broadcast %219 : f32 to vector<2x128xf32>
    %c12_68 = arith.constant 12 : index
    %221 = memref.load %arg7[%c12_68] : memref<16xf32, #tpu.memory_space<smem>>
    %222 = vector.broadcast %221 : f32 to vector<2x128xf32>
    %223 = arith.mulf %222, %44 : vector<2x128xf32>
    %224 = arith.addf %220, %223 : vector<2x128xf32>
    %c13_69 = arith.constant 13 : index
    %225 = memref.load %arg7[%c13_69] : memref<16xf32, #tpu.memory_space<smem>>
    %226 = vector.broadcast %225 : f32 to vector<2x128xf32>
    %227 = arith.mulf %226, %81 : vector<2x128xf32>
    %228 = arith.addf %224, %227 : vector<2x128xf32>
    %c14_70 = arith.constant 14 : index
    %229 = memref.load %arg7[%c14_70] : memref<16xf32, #tpu.memory_space<smem>>
    %230 = vector.broadcast %229 : f32 to vector<2x128xf32>
    %231 = arith.mulf %230, %118 : vector<2x128xf32>
    %232 = arith.addf %228, %231 : vector<2x128xf32>
    %c15_71 = arith.constant 15 : index
    %233 = memref.load %arg7[%c15_71] : memref<16xf32, #tpu.memory_space<smem>>
    %234 = vector.broadcast %233 : f32 to vector<2x128xf32>
    %235 = arith.mulf %234, %155 : vector<2x128xf32>
    %236 = arith.addf %232, %235 : vector<2x128xf32>
    %c0_72 = arith.constant 0 : index
    %c3_73 = arith.constant 3 : index
    %c0_74 = arith.constant 0 : index
    %c0_75 = arith.constant 0 : index
    %237 = vector.load %arg9[%c0_72, %c3_73, %c0_74, %c0_75] : memref<1x4x2x128xf32, #tpu.memory_space<vmem>>, vector<1x1x2x128xf32>
    %238 = vector.shape_cast %237 : vector<1x1x2x128xf32> to vector<2x128xf32>
    %239 = vector.shape_cast %236 : vector<2x128xf32> to vector<1x1x2x128xf32>
    tpu.vector_store %arg9[%c0_72, %c3_73, %c0_74, %c0_75], %239 {strides = array<i32>} : memref<1x4x2x128xf32, #tpu.memory_space<vmem>>, vector<1x1x2x128xf32>,
    return
  }
  func.func @transform_0(%arg0: i32, %arg1: i32) -> (i32, i32, i32, i32) {
    %c0_i32 = arith.constant 0 : i32
    %c0_i32_0 = arith.constant 0 : i32
    %c0_i32_1 = arith.constant 0 : i32
    return %arg0, %c0_i32, %arg1, %c0_i32_0 : i32, i32, i32, i32
  }
  func.func @transform_1(%arg0: i32, %arg1: i32) -> i32 {
    %c0_i32 = arith.constant 0 : i32
    %c0_i32_0 = arith.constant 0 : i32
    return %c0_i32 : i32
  }
  func.func @transform_2(%arg0: i32, %arg1: i32) -> i32 {
    %c0_i32 = arith.constant 0 : i32
    %c0_i32_0 = arith.constant 0 : i32
    return %c0_i32 : i32
  }
  func.func @transform_3(%arg0: i32, %arg1: i32) -> i32 {
    %c0_i32 = arith.constant 0 : i32
    %c0_i32_0 = arith.constant 0 : i32
    return %c0_i32 : i32
  }
  func.func @transform_4(%arg0: i32, %arg1: i32) -> i32 {
    %c0_i32 = arith.constant 0 : i32
    %c0_i32_0 = arith.constant 0 : i32
    return %c0_i32 : i32
  }
  func.func @transform_5(%arg0: i32, %arg1: i32) -> i32 {
    %c0_i32 = arith.constant 0 : i32
    %c0_i32_0 = arith.constant 0 : i32
    return %c0_i32 : i32
  }
  func.func @transform_6(%arg0: i32, %arg1: i32) -> i32 {
    %c0_i32 = arith.constant 0 : i32
    %c0_i32_0 = arith.constant 0 : i32
    return %c0_i32 : i32
  }
  func.func @transform_7(%arg0: i32, %arg1: i32) -> (i32, i32, i32, i32) {
    %c0_i32 = arith.constant 0 : i32
    %c0_i32_0 = arith.constant 0 : i32
    %c0_i32_1 = arith.constant 0 : i32
    return %arg0, %c0_i32, %arg1, %c0_i32_0 : i32, i32, i32, i32
  }
}

</mosaic_0001>

<bundles_post_ra>
// kernel: tpu_custom_call.1
= control target key start
LH: loop header
LB: loop body
LE: loop exit
PB: predicated region body
PF: predicated region fallthrough
CT: control target
= control target key end

     0   :  { %s1644_s0 = inlined_call_operand.hbm [shape: f32[2,4,2,128], index: 0, kind: input, shape index: {}]   ;;  %s1645_s1 = inlined_call_operand.hbm [shape: f32[16], index: 1, kind: input, shape index: {}]   ;;  %s1646_s2 = inlined_call_operand.vmem [shape: f32[4], index: 2, kind: input, shape index: {}]   ;;  %s1647_s3 = inlined_call_operand.vmem [shape: f32[16], index: 3, kind: input, shape index: {}]   ;;  %s1648_s4 = inlined_call_operand.vmem [shape: f32[4], index: 4, kind: input, shape index: {}]   ;;  %s1649_s5 = inlined_call_operand.vmem [shape: f32[16], index: 5, kind: input, shape index: {}]   ;;  %s1650_s6 = inlined_call_operand.vmem [shape: f32[4], index: 6, kind: input, shape index: {}]   ;;  %s1651_s7 = inlined_call_operand.hbm [shape: f32[2,4,2,128], index: 7, kind: output, shape index: {}]  }
   0x1   :  { %1653 = sst [smem:[#allocation22_spill]] %s1644_s0 }
   0x2   :  { %1654 = sst [smem:[#allocation23_spill]] %s1645_s1 }
   0x3   :  { %1655 = sst [smem:[#allocation24_spill]] %s1646_s2 }
   0x4   :  { %1656 = sst [smem:[#allocation25_spill]] %s1647_s3 }
   0x5   :  { %1657 = sst [smem:[#allocation26_spill]] %s1648_s4 }
   0x6   :  { %1658 = sst [smem:[#allocation27_spill]] %s1649_s5 }
   0x7   :  { %12 = vsyncpa [#allocation3], 0 }
   0x8   :  { %14 = vsyncpa [#allocation3 + $0x1], 0 }
   0x9   :  { %15 = vsyncpa [#allocation5], 0 }
   0xa   :  { %16 = vsyncpa [#allocation6], 0 }
   0xb   :  { %17 = vsyncpa [#allocation10], 0 }
   0xc   :  { %18 = vsyncpa [#allocation13], 0 }
   0xd   :  { %19 = vsyncpa [#allocation4], 0 }
   0xe   :  { %21 = vsyncpa [#allocation4 + $0x1], 0  ;;  %s1277_s24 = smov 0   ;;  %s1279_s25 = smov 0  }
   0xf   :  { %s1281_s26 = smov 0   ;;  %s1283_s27 = smov 0  }
  0x10   :  { %s1285_s28 = smov 0   ;;  %s1287_s29 = smov 0  }
  0x11 LB: > { %s1659_s3 = sld [smem:[#allocation25_spill]]  ;;  %s791_s10 = sadd.s32 4294967295, %s1225_s29   ;;  %s1225_s29 = sphi %s1287_s29, %s27_s29   ;;  %s1221_s28 = sphi %s1285_s28, %s1677_s28   ;;  %s1217_s27 = sphi %s1283_s27, %s1676_s27   ;;  %s1213_s26 = sphi %s1281_s26, %s1675_s26   ;;  %s1209_s25 = sphi %s1279_s25, %s1674_s25   ;;  %s1205_s24 = sphi %s1277_s24, %s1673_s24  }
  0x12   : > { %p793_p0 = scmp.ge.s32.totalorder %s1225_s29, 1  ;;  %p1314_p1 = scmp.eq.s32.totalorder %s791_s10, 0 }
  0x13   : > { %p226_p2 = scmp.lt.s32.totalorder %s1225_s29, 3  ;;  %p800_p4 = scmp.ge.s32.totalorder %s1225_s29, 2 }
  0x14   : > { %s1662_s5 = sld [smem:[#allocation27_spill]]  ;;  %s1227_s23 = smov [#allocation9]  }
  0x15   : > { %p1319_p3 = pnand %p793_p0, %p226_p2  ;;  %s1663_s1 = sld [smem:[#allocation23_spill]] }
  0x16   : > { %s1665_s2 = sld [smem:[#allocation24_spill]]  ;;  %s1228_s30 = smov [#allocation12]  }
  0x17   : > { %s258_s9 = sshll.u32 %s1659_s3, 4  ;;  %p908_p5 = pneg %p1319_p3  ;;  %s259_s9 = int_to_ptr.vmem [resolvable:$true] %s258_s9 }
  0x18   : > { %s1229_s8 = smov [#allocation7]   ;;  %s1230_s13 = smov [#allocation8]  }
  0x19   : > { %p1334_p6 = pnand %p908_p5, %p1314_p1  ;;  %s1666_s4 = sld [smem:[#allocation26_spill]] }
  0x1a   : > { %s278_s15 = sshll.u32 %s1662_s5, 4  ;;  %s288_s20 = sshll.u32 %s1650_s6, 4  ;;  %s279_s15 = int_to_ptr.vmem [resolvable:$true] %s278_s15  ;;  %s289_s20 = int_to_ptr.vmem [resolvable:$true] %s288_s20 }
  0x1b   : > { %s238_s18 = sshll.u32 %s1663_s1, 4  ;;  %s1232_s21 = smov [#allocation14]   ;;  %s239_s18 = int_to_ptr.hbm [resolvable:$true] %s238_s18 }
  0x1c   : > { %s248_s22 = sshll.u32 %s1665_s2, 4  ;;  %p55_p8 = scmp.ne.s32.totalorder %s1213_s26, %s1209_s25  ;;  %s249_s22 = int_to_ptr.vmem [resolvable:$true] %s248_s22 }
  0x1d   : > { %917 = dma.vmem_to_smem (!%p1334_p6), %s259_s9, 16, %s1227_s23, [#allocation10]  }
  0x1e   : > { %923 = dma.vmem_to_smem (!%p1334_p6), %s279_s15, 16, %s1228_s30, [#allocation13]  }
  0x1f   : > { %911 = dma.hbm_to_smem (!%p1334_p6), %s239_s18, 16, %s1229_s8, [#allocation5]  }
  0x20   : > { %914 = dma.vmem_to_smem (!%p1334_p6), %s249_s22, 16, %s1230_s13, [#allocation6]  }
  0x21   : > { %s268_s9 = sshll.u32 %s1666_s4, 4  ;;  %s1231_s18 = smov [#allocation11]   ;;  %s269_s9 = int_to_ptr.vmem [resolvable:$true] %s268_s9 }
  0x22   : > { %920 = dma.vmem_to_smem (!%p1334_p6), %s269_s9, 16, %s1231_s18, [#allocation10]  }
  0x23   : > { %926 = dma.vmem_to_smem (!%p1334_p6), %s289_s20, 16, %s1232_s21, [#allocation13]  }
  0x24   : > { %s792_s22 = sadd.s32 4294967294, %s1225_s29   ;;  %s39_s23 = sadd.s32 1, %s1221_s28 }
  0x25   : > { %p41_p7 = scmp.ge.s32.totalorder %s39_s23, 2  ;;  %s48_s30 = sadd.s32 1, %s1213_s26 }
  0x26   : > { %p56_p9 = scmp.eq.s32.totalorder %s1225_s29, 0  ;;  %p61_p11 = scmp.ne.s32.totalorder %s1209_s25, %s1205_s24 }
  0x27   : > { %s1679_s23 = smov (%p41_p7, %s39_s23), 0  ;;  %p213_p12 = scmp.eq.s32.totalorder %s791_s10, 1 }
  0x28   : > { %p1367_p10 = por %p56_p9, %p55_p8  ;;  %s43_s19 = ssub.s32 %s1221_s28, %s1679_s23 }
  0x29   : > { %p46_p13 = scmp.eq.s32.totalorder %s43_s19, 0  ;;  %p1379_p0 = por %p1314_p1, %p61_p11 }
  0x2a   : > { %p1383_p2 = por %p213_p12, %p55_p8  ;;  %p219_p5 = scmp.eq.s32.totalorder %s792_s22, 1 }
  0x2b   : > { %s1388_s16 = scalar_select %p46_p13, %s1213_s26, %s48_s30  }
  0x2c   : > { %p1390_p6 = por %p219_p5, %p61_p11  ;;  %p941_p7 = scmp.lt.s32.totalorder %s1225_s29, 2 }
  0x2d   : > { %s299_s10 = sand.u32 1, %s1213_s26   ;;  %s878_s17 = sshll.u32 %s1221_s28, 3 }
  0x2e   : > { %s801_s15 = sshll.u32 %s299_s10, 3  ;;  %s1671_s0 = sld [smem:[#allocation22_spill]] }
  0x2f   : > { %s303_s1 = scalar_lea.vmem [#allocation2], %s801_s15  ;;  %p928_p8 = pnand %p941_p7, %p1367_p10 }
  0x30   : > { %s312_s2 = sshll.u32 %s303_s1, 4  ;;  %s300_s22 = scalar_lea.sflag [#allocation3], %s299_s10  ;;  %s313_s2 = int_to_ptr.vmem [resolvable:$true] %s312_s2 }
  0x31   : > { %s1233_s30 = smov 32   ;;  %s1234_s3 = smov 2  }
  0x32   : > { %324 = sbr.rel (%p1319_p3) target bundleno = 143 (0x8f), region = 48  ;;  %s1405_s4 = sand.u32 (!%p1319_p3), 1, %s1209_s25  }
  0x33   : > { %s327_s1 = scalar_lea.sflag (!%p1319_p3), [#allocation3], %s1405_s4 }
  0x34   : > { %s309_s21 = scalar_lea.hbm %s1671_s0, %s878_s17  ;;  %s1652_s17 = sshll.u32 (!%p1319_p3), %s1405_s4, 3 }
  0x35   : > { %s310_s19 = sshll.u32 %s309_s21, 4  ;;  %s1411_s15 = scalar_lea.vmem (!%p1319_p3), [#allocation2], %s1652_s17  ;;  %s311_s19 = int_to_ptr.hbm [resolvable:$true] %s310_s19 }
  0x36   : > { %930 = dma.hbm_to_vmem [thread:$0]  (!%p928_p8), %s311_s19, 128, %s313_s2, %s300_s22, %s1233_s30, %s1233_s30, %s1234_s3  }
  0x37   : > { %1180 = dma.done.wait (%p1379_p0), %s327_s1, 128  }
  0x38   : > { %1182 = vsyncadd (%p1379_p0), %s327_s1, 4294967168 }
  0x39   : > { %1184 = dma.done.wait (%p1314_p1), [#allocation5], 16  }
  0x3a   : > { %1186 = vsyncadd (%p1314_p1), [#allocation5], 4294967280 }
  0x3b   : > { %1188 = dma.done.wait (%p1314_p1), [#allocation6], 16  }
  0x3c   : > { %1190 = vsyncadd (%p1314_p1), [#allocation6], 4294967280 }
  0x3d   : > { %1192 = dma.done.wait (%p1314_p1), [#allocation10], 32  }
  0x3e   : > { %1194 = vsyncadd (%p1314_p1), [#allocation10], 4294967264 }
  0x3f   : > { %1196 = dma.done.wait (%p1314_p1), [#allocation13], 32  }
  0x40   : > { %1198 = vsyncadd (%p1314_p1), [#allocation13], 4294967264 }
  0x41   : > { %366 = sfence }
  0x42   : > { %s400_s2 = sld [smem:[#allocation8]]  ;;  %v1450_v0 = vld [vmem:[%s1411_s15] sm:$0x3]  ;;  %v1458_v4 = vld [vmem:[%s1411_s15 + $0x2] sm:$0x3] }
  0x43   : > { %s1433_s3 = sld [smem:[#allocation11]]  ;;  %v1473_v14 = vld [vmem:[%s1411_s15 + $0x4] sm:$0x3]  ;;  %v1489_v26 = vld [vmem:[%s1411_s15 + $0x6] sm:$0x3] }
  0x44   : > { %s404_s12 = sld [smem:[#allocation7]] }
  0x45   : > { %s408_s8 = sld [smem:[#allocation9]] }
  0x46   : > { %s816_s13 = sld [smem:[#allocation7 + $0x1]] }
  0x47   : > { %s1435_s10 = sld [smem:[#allocation9 + $0x1]] }
  0x48   : > { %s1437_s20 = sld [smem:[#allocation7 + $0x2]]  ;;  %v401_v5 = vstv %s400_s2 }
  0x49   : > { %s1439_s18 = sld [smem:[#allocation9 + $0x2]]  ;;  %v403_v8 = vstv %s1433_s3 }
  0x4a   : > { %s1441_s21 = sld [smem:[#allocation7 + $0x3]]  ;;  %v405_v1 = vstv %s404_s12 }
  0x4b   : > { %s1443_s19 = sld [smem:[#allocation9 + $0x3]]  ;;  %v409_v2 = vstv %s408_s8  ;;  %v406_v3 = vmul.f32 %v405_v1, %v1450_v0 }
  0x4c   : > { %s1445_s11 = sld [smem:[#allocation8 + $0x1]]  ;;  %v413_v6 = vstv %s816_s13  ;;  %v410_v7 = vmul.f32 %v409_v2, %v1450_v0 }
  0x4d   : > { %s1447_s22 = sld [smem:[#allocation11 + $0x1]]  ;;  %v407_v10 = vadd.f32 %v406_v3, %v401_v5  ;;  %v414_v11 = vmul.f32 %v1458_v4, %v413_v6  ;;  %v417_v12 = vstv %s1435_s10 }
  0x4e   : > { %s824_s30 = sld [smem:[#allocation7 + $0x4]]  ;;  %v421_v15 = vstv %s1437_s20  ;;  %v411_v16 = vadd.f32 %v410_v7, %v403_v8  ;;  %v418_v18 = vmul.f32 %v1458_v4, %v417_v12 }
  0x4f   : > { %s825_s1 = sld [smem:[#allocation9 + $0x4]]  ;;  %v415_v22 = vadd.f32 %v414_v11, %v407_v10  ;;  %v422_v23 = vmul.f32 %v1473_v14, %v421_v15  ;;  %v425_v27 = vstv %s1439_s18 }
  0x50   : > { %s1452_s17 = sld [smem:[#allocation7 + $0x5]]  ;;  %v429_v28 = vstv %s1441_s21  ;;  %v419_v31 = vadd.f32 %v418_v18, %v411_v16  ;;  %v426_v35 = vmul.f32 %v1473_v14, %v425_v27 }
  0x51   : > { %s1455_s0 = sld [smem:[#allocation9 + $0x5]]  ;;  %v423_v34 = vadd.f32 %v422_v23, %v415_v22  ;;  %v430_v36 = vmul.f32 %v1489_v26, %v429_v28  ;;  %v433_v38 = vstv %s1443_s19 }
  0x52   : > { %s1460_s5 = sld [smem:[#allocation7 + $0x6]]  ;;  %v438_v19 = vstv %s1445_s11  ;;  %v427_v2 = vadd.f32 %v426_v35, %v419_v31  ;;  %v434_v3 = vmul.f32 %v1489_v26, %v433_v38 }
  0x53   : > { %s1463_s12 = sld [smem:[#allocation9 + $0x6]]  ;;  %v440_v24 = vstv %s1447_s22  ;;  %v431_v10 = vadd.f32 %v430_v36, %v423_v34 }
  0x54   : > { %v442_v9 = vstv %s824_s30  ;;  %s1466_s8 = sld [smem:[#allocation7 + $0x7]]  ;;  %v435_v18 = vadd.f32 %v434_v3, %v427_v2 }
  0x55   : > { %v446_v13 = vstv %s825_s1  ;;  %s1470_s2 = sld [smem:[#allocation9 + $0x7]]  ;;  %v443_v17 = vmul.f32 %v442_v9, %v1450_v0 }
  0x56   : > { %s1476_s13 = sld [smem:[#allocation8 + $0x2]]  ;;  %v447_v20 = vmul.f32 %v446_v13, %v1450_v0  ;;  %v450_v21 = vstv %s1452_s17 }
  0x57   : > { %s1479_s3 = sld [smem:[#allocation11 + $0x2]]  ;;  %v454_v25 = vstv %s1455_s0  ;;  %v444_v29 = vadd.f32 %v443_v17, %v438_v19  ;;  %v451_v30 = vmul.f32 %v1458_v4, %v450_v21 }
  0x58   : > { %s834_s10 = sld [smem:[#allocation7 + $0x8]]  ;;  %v448_v32 = vadd.f32 %v447_v20, %v440_v24  ;;  %v455_v33 = vmul.f32 %v1458_v4, %v454_v25  ;;  %v458_v37 = vstv %s1460_s5 }
  0x59   : > { %s835_s20 = sld [smem:[#allocation9 + $0x8]]  ;;  %v462_v39 = vstv %s1463_s12  ;;  %v452_v42 = vadd.f32 %v451_v30, %v444_v29  ;;  %v459_v47 = vmul.f32 %v1473_v14, %v458_v37  ;;  %v1564_v37 = vmul.f32 %v435_v18, %v431_v10 }
  0x5a   : > { %s836_s30 = sld [smem:[#allocation7 + $0x9]]  ;;  %v456_v46 = vadd.f32 %v455_v33, %v448_v32  ;;  %v463_v50 = vmul.f32 %v1473_v14, %v462_v39  ;;  %v466_v54 = vstv %s1466_s8 }
  0x5b   : > { %s1494_s17 = sld [smem:[#allocation9 + $0x9]]  ;;  %v470_v58 = vstv %s1470_s2  ;;  %v460_v6 = vadd.f32 %v459_v47, %v452_v42  ;;  %v467_v8 = vmul.f32 %v1489_v26, %v466_v54 }
  0x5c   : > { %s1497_s0 = sld [smem:[#allocation7 + $0xa]]  ;;  %v475_v40 = vstv %s1476_s13  ;;  %v464_v7 = vadd.f32 %v463_v50, %v456_v46  ;;  %v471_v9 = vmul.f32 %v1489_v26, %v470_v58 }
  0x5d   : > { %s1502_s15 = sld [smem:[#allocation9 + $0xa]]  ;;  %v477_v43 = vstv %s1479_s3  ;;  %v468_v22 = vadd.f32 %v467_v8, %v460_v6 }
  0x5e   : > { %v479_v41 = vstv %s834_s10  ;;  %s1507_s18 = sld [smem:[#allocation7 + $0xb]]  ;;  %v472_v23 = vadd.f32 %v471_v9, %v464_v7 }
  0x5f   : > { %v480_v44 = vmul.f32 %v479_v41, %v1450_v0  ;;  %v483_v45 = vstv %s835_s20  ;;  %s1511_s21 = sld [smem:[#allocation9 + $0xb]] }
  0x60   : > { %v484_v48 = vmul.f32 %v483_v45, %v1450_v0  ;;  %v487_v49 = vstv %s836_s30  ;;  %s1515_s5 = sld [smem:[#allocation8 + $0x3]]  ;;  %v1568_v41 = vmul.f32 %v472_v23, %v468_v22 }
  0x61   : > { %v481_v51 = vadd.f32 %v480_v44, %v475_v40  ;;  %v488_v52 = vmul.f32 %v1458_v4, %v487_v49  ;;  %v491_v53 = vstv %s1494_s17  ;;  %s1520_s19 = sld [smem:[#allocation11 + $0x3]] }
  0x62   : > { %v485_v55 = vadd.f32 %v484_v48, %v477_v43  ;;  %v492_v56 = vmul.f32 %v1458_v4, %v491_v53  ;;  %v495_v57 = vstv %s1497_s0  ;;  %s1525_s11 = sld [smem:[#allocation7 + $0xc]] }
  0x63   : > { %v489_v59 = vadd.f32 %v488_v52, %v481_v51  ;;  %v496_v60 = vmul.f32 %v1473_v14, %v495_v57  ;;  %v499_v61 = vstv %s1502_s15  ;;  %s845_s22 = sld [smem:[#allocation9 + $0xc]] }
  0x64   : > { %v493_v62 = vadd.f32 %v492_v56, %v485_v55  ;;  %v500_v63 = vmul.f32 %v1473_v14, %v499_v61  ;;  %v503_v1 = vstv %s1507_s18  ;;  %s1532_s1 = sld [smem:[#allocation7 + $0xd]] }
  0x65   : > { %v507_v5 = vstv %s1511_s21  ;;  %s1536_s12 = sld [smem:[#allocation9 + $0xd]]  ;;  %v497_v11 = vadd.f32 %v496_v60, %v489_v59  ;;  %v504_v12 = vmul.f32 %v1489_v26, %v503_v1 }
  0x66   : > { %s1540_s8 = sld [smem:[#allocation7 + $0xe]]  ;;  %v501_v13 = vadd.f32 %v500_v63, %v493_v62  ;;  %v508_v15 = vmul.f32 %v1489_v26, %v507_v5  ;;  %v512_v16 = vstv %s1515_s5 }
  0x67   : > { %s1543_s2 = sld [smem:[#allocation9 + $0xe]]  ;;  %v514_v19 = vstv %s1520_s19  ;;  %v505_v27 = vadd.f32 %v504_v12, %v497_v11 }
  0x68   : > { %v516_v17 = vstv %s1525_s11  ;;  %s1548_s13 = sld [smem:[#allocation7 + $0xf]]  ;;  %v509_v31 = vadd.f32 %v508_v15, %v501_v13 }
  0x69   : > { %v517_v20 = vmul.f32 %v516_v17, %v1450_v0  ;;  %v520_v21 = vstv %s845_s22  ;;  %s1552_s3 = sld [smem:[#allocation9 + $0xf]] }
  0x6a   : > { %v521_v24 = vmul.f32 %v520_v21, %v1450_v0  ;;  %v524_v25 = vstv %s1532_s1  ;;  %s1556_s10 = sld [smem:[#allocation14]]  ;;  %v1574_v44 = vmul.f32 %v509_v31, %v505_v27 }
  0x6b   : > { %v518_v28 = vadd.f32 %v517_v20, %v512_v16  ;;  %v525_v29 = vmul.f32 %v1458_v4, %v524_v25  ;;  %v528_v30 = vstv %s1536_s12  ;;  %s550_s20 = sld [smem:[#allocation12]] }
  0x6c   : > { %v522_v32 = vadd.f32 %v521_v24, %v514_v19  ;;  %v529_v33 = vmul.f32 %v1458_v4, %v528_v30  ;;  %v532_v34 = vstv %s1540_s8  ;;  %s852_s30 = sld [smem:[#allocation12 + $0x1]] }
  0x6d   : > { %v526_v35 = vadd.f32 %v525_v29, %v518_v28  ;;  %v533_v0 = vmul.f32 %v1473_v14, %v532_v34  ;;  %v536_v36 = vstv %s1543_s2  ;;  %s853_s17 = sld [smem:[#allocation12 + $0x2]] }
  0x6e   : > { %v530_v38 = vadd.f32 %v529_v33, %v522_v32  ;;  %v537_v39 = vmul.f32 %v1473_v14, %v536_v36  ;;  %v540_v40 = vstv %s1548_s13  ;;  %s854_s0 = sld [smem:[#allocation12 + $0x3]] }
  0x6f   : > { %v534_v42 = vadd.f32 %v533_v0, %v526_v35  ;;  %v541_v4 = vmul.f32 %v1489_v26, %v540_v40  ;;  %v544_v43 = vstv %s1552_s3  ;;  %s1572_s15 = sld [smem:[#allocation14 + $0x1]] }
  0x70   : > { %v538_v45 = vadd.f32 %v537_v39, %v530_v38  ;;  %v545_v46 = vmul.f32 %v1489_v26, %v544_v43  ;;  %s856_s18 = sld [smem:[#allocation12 + $0x4]]  ;;  %v549_v48 = vstv %s1556_s10  ;;  %s1672_s10 = sshll.u32 %s1405_s4, 3 }
  0x71   : > { %v542_v47 = vadd.f32 %v541_v4, %v534_v42  ;;  %v551_v49 = vstv %s550_s20  ;;  %s857_s21 = sld [smem:[#allocation12 + $0x5]]  ;;  %s1592_s20 = scalar_lea.vmem [#allocation15], %s1672_s10 }
  0x72   : > { %v546_v14 = vadd.f32 %v545_v46, %v538_v45  ;;  %v552_v50 = vmul.f32 %v551_v49, %v1564_v37  ;;  %v555_v51 = vstv %s852_s30  ;;  %s858_s5 = sld [smem:[#allocation12 + $0x6]] }
  0x73   : > { %v556_v52 = vmul.f32 %v555_v51, %v1568_v41  ;;  %v559_v53 = vstv %s853_s17  ;;  %s859_s19 = sld [smem:[#allocation12 + $0x7]] }
  0x74   : > { %v547_v54 = vmul.f32 %v546_v14, %v542_v47  ;;  %v553_v55 = vadd.f32 %v552_v50, %v549_v48  ;;  %v560_v56 = vmul.f32 %v559_v53, %v1574_v44  ;;  %v563_v26 = vstv %s854_s0  ;;  %s1581_s11 = sld [smem:[#allocation14 + $0x2]]  ;;  %s879_s0 = sshll.u32 %s1217_s27, 3 }
  0x75   : > { %s862_s22 = sld [smem:[#allocation12 + $0x8]]  ;;  %v568_v59 = vstv %s1572_s15  ;;  %s640_s27 = scalar_lea.hbm %s1651_s7, %s879_s0 }
  0x76   : > { %v557_v57 = vadd.f32 %v556_v52, %v553_v55  ;;  %v564_v58 = vmul.f32 %v563_v26, %v547_v54  ;;  %v570_v60 = vstv %s856_s18  ;;  %s863_s1 = sld [smem:[#allocation12 + $0x9]] }
  0x77   : > { %v571_v61 = vmul.f32 %v570_v60, %v1564_v37  ;;  %v574_v62 = vstv %s857_s21  ;;  %s864_s12 = sld [smem:[#allocation12 + $0xa]]  ;;  %s641_s21 = sshll.u32 %s1592_s20, 4  ;;  %s642_s21 = int_to_ptr.vmem [resolvable:$true] %s641_s21 }
  0x78   : > { %v561_v63 = vadd.f32 %v560_v56, %v557_v57  ;;  %v575_v1 = vmul.f32 %v574_v62, %v1568_v41  ;;  %v578_v2 = vstv %s858_s5  ;;  %s865_s8 = sld [smem:[#allocation12 + $0xb]]  ;;  %s643_s5 = sshll.u32 %s640_s27, 4  ;;  %s644_s5 = int_to_ptr.hbm [resolvable:$true] %s643_s5 }
  0x79   : > { %v572_v3 = vadd.f32 %v571_v61, %v568_v59  ;;  %v579_v5 = vmul.f32 %v578_v2, %v1574_v44  ;;  %v582_v6 = vstv %s859_s19  ;;  %s1587_s2 = sld [smem:[#allocation14 + $0x3]]  ;;  %s628_s19 = scalar_lea.sflag [#allocation4], %s1405_s4 }
  0x7a   : > { %v565_v7 = vadd.f32 %v564_v58, %v561_v63  ;;  %s868_s13 = sld [smem:[#allocation12 + $0xc]]  ;;  %v583_v9 = vmul.f32 %v582_v6, %v547_v54  ;;  %v588_v10 = vstv %s1581_s11  ;;  %s1141_s11 = sshra.s32 %s644_s5, 4  ;;  %s1142_s11 = int_to_ptr.hbm [resolvable:$true] %s1141_s11 }
  0x7b   : > { %v576_v8 = vadd.f32 %v575_v1, %v572_v3  ;;  %v590_v11 = vstv %s862_s22  ;;  %s869_s3 = sld [smem:[#allocation12 + $0xd]]  ;;  %s1143_s22 = scalar_lea.hbm %s1142_s11, 8 }
  0x7c   : > { %566 = vst [vmem:[%s1592_s20] sm:$0x3] %v565_v7  ;;  %v591_v12 = vmul.f32 %v590_v11, %v1564_v37  ;;  %v594_v13 = vstv %s863_s1  ;;  %s870_s30 = sld [smem:[#allocation12 + $0xe]]  ;;  %p1144_p1 = scmp.ne.s32.totalorder %s1142_s11, %s1143_s22 }
  0x7d   : > { %v580_v15 = vadd.f32 %v579_v5, %v576_v8  ;;  %v595_v16 = vmul.f32 %v594_v13, %v1568_v41  ;;  %v598_v17 = vstv %s864_s12  ;;  %s871_s17 = sld [smem:[#allocation12 + $0xf]]  ;;  %p1148_p10 = scmp.lt.s32.totalorder %s1142_s11, %s1651_s7 }
  0x7e   : > { %v592_v18 = vadd.f32 %v591_v12, %v588_v10  ;;  %v599_v19 = vmul.f32 %v598_v17, %v1574_v44  ;;  %v602_v20 = vstv %s865_s8  ;;  %p1145_p3 = pnand %p1144_p1, %p1383_p2  ;;  %s1147_s8 = scalar_lea.hbm %s1651_s7, 16 }
  0x7f   : > { %v584_v21 = vadd.f32 %v583_v9, %v580_v15  ;;  %v603_v23 = vmul.f32 %v602_v20, %v547_v54  ;;  %v608_v24 = vstv %s1587_s2  ;;  %p1149_p11 = scmp.lt.s32.totalorder %s1147_s8, %s1143_s22 }
  0x80   : > { %v596_v22 = vadd.f32 %v595_v16, %v592_v18  ;;  %v610_v25 = vstv %s868_s13  ;;  %p1146_p9 = pneg %p1145_p3 }
  0x81   : > { %860 = vst [vmem:[%s1592_s20 + $0x2] sm:$0x3] %v584_v21  ;;  %v611_v27 = vmul.f32 %v610_v25, %v1564_v37  ;;  %v614_v28 = vstv %s869_s3  ;;  %p1150_p12 = por %p1149_p11, %p1148_p10 }
  0x82   : > { %v600_v29 = vadd.f32 %v599_v19, %v596_v22  ;;  %v615_v30 = vmul.f32 %v614_v28, %v1568_v41  ;;  %v618_v31 = vstv %s870_s30 }
  0x83   : > { %v612_v32 = vadd.f32 %v611_v27, %v608_v24  ;;  %v619_v33 = vmul.f32 %v618_v31, %v1574_v44  ;;  %v622_v34 = vstv %s871_s17  ;;  %p1151_p13 = pnand %p1150_p12, %p1146_p9 }
  0x84   : > { %v604_v35 = vadd.f32 %v603_v23, %v600_v29  ;;  %v623_v36 = vmul.f32 %v622_v34, %v547_v54 }
  0x85   : > { %v616_v0 = vadd.f32 %v615_v30, %v612_v32 }
  0x86   : > { %866 = vst [vmem:[%s1592_s20 + $0x4] sm:$0x3] %v604_v35 }
  0x87   : > { %v620_v37 = vadd.f32 %v619_v33, %v616_v0 }
  0x89   : > { %v624_v38 = vadd.f32 %v623_v36, %v620_v37 }
  0x8b   : > { %872 = vst [vmem:[%s1592_s20 + $0x6] sm:$0x3] %v624_v38 }
  0x8c   : > { %1154 = shalt.err (!%p1151_p13)
}
  0x8d   : > { %s1235_s4 = smov 32   ;;  %s1236_s3 = smov 2  }
  0x8e   : > { %906 = dma.vmem_to_hbm [thread:$0]  (%p1383_p2), %s642_s21, 128, %s644_s5, %s628_s19, %s1235_s4, %s1235_s4, %s1236_s3  }
  0x8f PF: > { %s658_s10 = sand.u32 1, %s1205_s24   ;;  %p932_p0 = pnand %p800_p4, %p1390_p6 }
  0x90   : > { %s659_s20 = scalar_lea.sflag [#allocation4], %s658_s10 }
  0x91   : > { %p933_p5 = pneg %p932_p0 }
  0x93   : > { %1200 = dma.done.wait (%p933_p5), %s659_s20, 128  }
  0x94   : > { %1202 = vsyncadd (%p933_p5), %s659_s20, 4294967168  ;;  %s27_s29 = sadd.s32 1, %s1225_s29   ;;  %s1673_s24 = smov %s1209_s25 }
  0x95   : > { %p24_p7 = scmp.ge.s32.totalorder %s27_s29, 4   ;;  %s1674_s25 = smov %s1213_s26 }
  0x96   : > { %s1675_s26 = smov %s1388_s16  ;;  %s1676_s27 = smov %s1221_s28 }
  0x97   : > { %s1677_s28 = smov %s1679_s23  ;;  %26 = sbr.rel (!%p24_p7) target bundleno = 17 (0x11), region = 125 }
  0x9c   :  { %665 = vsyncpa [#allocation3], 1 }
  0x9d   :  { %667 = vsyncpa [#allocation3 + $0x1], 1 }
  0x9e   :  { %668 = vsyncpa [#allocation4], 1 }
  0x9f   :  { %670 = vsyncpa [#allocation4 + $0x1], 1 }
  0xa0   :  { %671 = vsyncpa [#allocation5], 1 }
  0xa1   :  { %673 = vsyncpa [#allocation5 + $0x1], 1 }
  0xa2   :  { %674 = vsyncpa [#allocation6], 1 }
  0xa3   :  { %676 = vsyncpa [#allocation6 + $0x1], 1 }
  0xa4   :  { %677 = vsyncpa [#allocation10], 1 }
  0xa5   :  { %678 = vsyncpa [#allocation13], 1 }

</bundles_post_ra>
